<compile_context>
chip_gen: v6e
topology: v6e:2x2x1
jax: 0.10.0
libtpu: 0.0.40
codegen_flags: <defaults>
</compile_context>

<pallas_src>
import functools

import jax
import jax.numpy as jnp
from jax.experimental import pallas as pl
from jax.experimental.pallas import tpu as pltpu


# ----------------------------------------------------------------------------
# tiling helpers
# ----------------------------------------------------------------------------
def _pick_tile(n, cap, quantum):
    """Largest multiple of `quantum` that divides n and is <= cap, else n."""
    if n <= cap:
        return n
    t = (cap // quantum) * quantum
    while t >= quantum:
        if n % t == 0:
            return t
        t -= quantum
    return n


def _spatial_tile(hw, cap=2048):
    if hw <= cap:
        return hw                      # full dim -> allowed block, no ragged edge
    t = (cap // 128) * 128
    while t >= 128:
        if hw % t == 0:
            return t
        t -= 128
    return cap                         # ragged edge: masked store on last tile only


# ----------------------------------------------------------------------------
# Pallas kernel 1: complex channel contraction over all (lo+hi) Fourier modes
#   out[b, o, l] = sum_i x[b, i, l] * w[i, o, l]   (complex, lane axis = modes)
# ----------------------------------------------------------------------------
def _spectral_kernel(xr_ref, xi_ref, wr_ref, wi_ref, or_ref, oi_ref):
    # xr/xi: (Cin, B, tl) f32   wr/wi: (Cin, tco, tl) f32   out: (B, tco, tl) f32
    cin, b, tl = xr_ref.shape
    tco = wr_ref.shape[1]

    def body(i, carry):
        acc_r, acc_i = carry
        xr = xr_ref[i][:, None, :]      # (B, 1, tl)   per-iteration ref load
        xi = xi_ref[i][:, None, :]
        wr = wr_ref[i][None, :, :]      # (1, tco, tl)
        wi = wi_ref[i][None, :, :]
        acc_r = acc_r + xr * wr - xi * wi
        acc_i = acc_i + xr * wi + xi * wr
        return acc_r, acc_i

    zero = jnp.zeros((b, tco, tl), jnp.float32)
    acc_r, acc_i = jax.lax.fori_loop(0, cin, body, (zero, zero),
                                     unroll=min(cin, 8))
    or_ref[...] = acc_r
    oi_ref[...] = acc_i


def spectral_mode_mult(xr, xi, wr, wi, batch, cout):
    # xr, xi: (Cin, B, Lp) f32   wr, wi: (Cin, Cout, Lp) f32, Lp % 128 == 0
    cin, _, lp = xr.shape
    tl = _pick_tile(lp, cap=512, quantum=128)     # lane-dense mode tiles
    tco = _pick_tile(cout, cap=32, quantum=8)     # bound VMEM / vreg pressure
    n_l = lp // tl
    n_co = cout // tco

    x_spec = pl.BlockSpec((cin, batch, tl), lambda co, l: (0, 0, l))
    w_spec = pl.BlockSpec((cin, tco, tl), lambda co, l: (0, co, l))
    o_spec = pl.BlockSpec((batch, tco, tl), lambda co, l: (0, co, l))

    flops = 8 * batch * cin * cout * lp                  # complex mul-add
    bytes_accessed = 4 * (2 * cin * batch * lp            # xr + xi
                          + 2 * cin * cout * lp           # wr + wi
                          + 2 * batch * cout * lp)        # out_r + out_i

    return pl.pallas_call(
        _spectral_kernel,
        out_shape=(jax.ShapeDtypeStruct((batch, cout, lp), jnp.float32),
                   jax.ShapeDtypeStruct((batch, cout, lp), jnp.float32)),
        grid=(n_co, n_l),
        in_specs=[x_spec, x_spec, w_spec, w_spec],
        out_specs=(o_spec, o_spec),
        compiler_params=pltpu.CompilerParams(
            dimension_semantics=("parallel", "parallel"),
            vmem_limit_bytes=32 * 1024 * 1024),
        cost_estimate=pl.CostEstimate(flops=flops, transcendentals=0,
                                      bytes_accessed=bytes_accessed),
    )(xr, xi, wr, wi)


# ----------------------------------------------------------------------------
# Pallas kernel 2: 1x1 conv (channel matmul) + bias + spectral add + activation
#   lane axis = flattened spatial (H*W), lane-dense tiles, in-kernel bf16 cast.
# ----------------------------------------------------------------------------
def _pointwise_kernel(x_ref, w_ref, b_ref, s_ref, o_ref, *, use_tanh):
    # x: (Cin, ts) f32   w: (Cout, Cin) bf16   b: (Cout, 1) f32   s: (Cout, ts) f32
    x = x_ref[...].astype(jnp.bfloat16)          # cast in-kernel (no extra HBM pass)
    y = jnp.dot(w_ref[...], x, preferred_element_type=jnp.float32)
    y = y + b_ref[...] + s_ref[...]
    if use_tanh:
        y = jnp.tanh(y)
    o_ref[...] = y


def pointwise_conv_add_act(x, conv_w_bf16, conv_b, spec, use_tanh):
    # x: (B, Cin, H, W) f32   conv_w_bf16: (Cout, Cin)   conv_b: (Cout, 1) f32
    # spec: (B, Cout, H, W) f32  ->  (B, Cout, H, W) f32
    B, Cin, H, W = x.shape
    Cout = conv_w_bf16.shape[0]
    HW = H * W
    ts = _spatial_tile(HW, cap=2048)
    # keep >=2 "parallel" grid steps when B == 1 (v7x has 2 TensorCores)
    if B == 1 and ts == HW and HW % 256 == 0:
        ts = HW // 2
    n_s = pl.cdiv(HW, ts)
    xf = x.reshape(B, Cin, HW)                   # f32 stream; bf16 cast is in-kernel
    sf = spec.reshape(B, Cout, HW)               # f32 (bf16 stream possible, see notes)
    kernel = functools.partial(_pointwise_kernel, use_tanh=use_tanh)

    flops = 2 * B * Cout * Cin * HW + 2 * B * Cout * HW
    bytes_accessed = (B * Cin * HW * 4 + Cout * Cin * 2 + Cout * 4
                      + 2 * B * Cout * HW * 4)

    out = pl.pallas_call(
        kernel,
        out_shape=jax.ShapeDtypeStruct((B, Cout, HW), jnp.float32),
        grid=(B, n_s),
        in_specs=[pl.BlockSpec((None, Cin, ts), lambda b, s: (b, 0, s)),
                  pl.BlockSpec((Cout, Cin), lambda b, s: (0, 0)),
                  pl.BlockSpec((Cout, 1), lambda b, s: (0, 0)),
                  pl.BlockSpec((None, Cout, ts), lambda b, s: (b, 0, s))],
        out_specs=pl.BlockSpec((None, Cout, ts), lambda b, s: (b, 0, s)),
        compiler_params=pltpu.CompilerParams(
            dimension_semantics=("parallel", "parallel"),
            vmem_limit_bytes=32 * 1024 * 1024),
        cost_estimate=pl.CostEstimate(
            flops=flops,
            transcendentals=(B * Cout * HW if use_tanh else 0),
            bytes_accessed=bytes_accessed),
    )(xf, conv_w_bf16, conv_b, sf)
    return out.reshape(B, Cout, H, W)


# ----------------------------------------------------------------------------
# Glue: SpectralConvBlock2D / FourierBlock2D / FourierIntegralKernel forward
# ----------------------------------------------------------------------------
def spectral_conv_2d(x, p):
    # x: (B, Cin, H, W) f32 -> (B, Cout, H, W) f32
    B, Cin, H, W = x.shape
    m1, m2 = p["modes"]
    Cout = p["cout"]
    M = m1 * m2
    L = 2 * M
    Lp = p["wr_packed"].shape[-1]
    Wr = W // 2 + 1
    assert 2 * m1 <= H and m2 <= Wr, (
        "n_modes too large for the (padded) grid: mode windows would overlap")

    # TODO(synk): rfft2/irfft2 computed with jnp.fft (no Pallas TPU FFT primitive).
    x_ft = jnp.fft.rfft2(x)                                     # (B,Cin,H,Wr) c64
    lo = x_ft[:, :, :m1, :m2].reshape(B, Cin, M)
    hi = x_ft[:, :, H - m1:, :m2].reshape(B, Cin, M)
    xc = jnp.transpose(jnp.concatenate([lo, hi], axis=-1), (1, 0, 2))  # (Cin,B,L)
    xr = jnp.real(xc).astype(jnp.float32)
    xi = jnp.imag(xc).astype(jnp.float32)
    if Lp > L:
        padw = ((0, 0), (0, 0), (0, Lp - L))
        xr = jnp.pad(xr, padw)
        xi = jnp.pad(xi, padw)

    out_r, out_i = spectral_mode_mult(xr, xi, p["wr_packed"], p["wi_packed"],
                                      B, Cout)

    out_c = jax.lax.complex(out_r[..., :L], out_i[..., :L])     # (B,Cout,L) c64
    lo_c = out_c[..., :M].reshape(B, Cout, m1, m2)
    hi_c = out_c[..., M:].reshape(B, Cout, m1, m2)
    mid = jnp.zeros((B, Cout, H - 2 * m1, m2), jnp.complex64)
    out_ft = jnp.concatenate([lo_c, mid, hi_c], axis=2)         # (B,Cout,H,m2)
    out_ft = jnp.pad(out_ft, ((0, 0), (0, 0), (0, 0), (0, Wr - m2)))
    return jnp.fft.irfft2(out_ft, s=(H, W)).astype(jnp.float32)


def fourier_block_2d(x, p):
    # x: (B, Cin, H, W) -> activation(spectral_conv(x) + conv1x1(x) + bias)
    spec = spectral_conv_2d(x, p)
    return pointwise_conv_add_act(x, p["conv_w"], p["conv_b"], spec, p["use_tanh"])


def fourier_integral_kernel_forward(x, params, padding):
    # x: (B, X, Y, C) channels-last, exactly as the PyTorch module's forward.
    x = jnp.transpose(x, (0, 3, 1, 2))                               # -> NCHW
    if padding > 0:
        x = jnp.pad(x, ((0, 0), (0, 0), (0, padding), (0, padding)),
                    mode="constant")
    for p in params:
        x = fourier_block_2d(x, p)
    if padding > 0:
        x = x[:, :, :-padding, :-padding]                            # strip padding
    return jnp.transpose(x, (0, 2, 3, 1))                            # back to NHWC


# ----------------------------------------------------------------------------
# Deterministic parameter construction (mirrors the module's __init__ shapes);
# weight packing (lo/hi fold onto a padded lane axis, bf16 conv weights) is
# done once here instead of per forward pass.
# ----------------------------------------------------------------------------
def init_params(key, input_numb_fields, output_numb_fields, n_modes,
                inner_size, n_layers):
    layers = [inner_size] * n_layers
    # func=Tanh -> [Tanh]*(n_layers-1) + [Identity]
    funcs = ["tanh"] * (len(layers) - 1) + ["identity"]
    # NOTE: as in the reference code, only len(layers) blocks are built, so the
    # final block outputs layers[-1] channels (output_numb_fields is unused).
    tmp_layers = [input_numb_fields] + layers + [output_numb_fields]
    m1, m2 = n_modes
    M = m1 * m2
    L = 2 * M
    Lp = ((L + 127) // 128) * 128           # lane-dense, 128-multiple mode axis
    params = []
    for i in range(len(layers)):
        cin, cout = tmp_layers[i], tmp_layers[i + 1]
        key, *sub = jax.random.split(key, 5)
        scale = 1.0 / (cin * cout)
        # leading 2 = (low-frequency, high-frequency) weight pair of the block
        wr = scale * jax.random.uniform(sub[0], (2, cin, cout, m1, m2), jnp.float32)
        wi = scale * jax.random.uniform(sub[1], (2, cin, cout, m1, m2), jnp.float32)

        def pack(w):
            w = jnp.concatenate([w[0].reshape(cin, cout, M),
                                 w[1].reshape(cin, cout, M)], axis=-1)
            return jnp.pad(w, ((0, 0), (0, 0), (0, Lp - L)))

        k = 1.0 / (cin ** 0.5)
        conv_w = jax.random.uniform(sub[2], (cout, cin), jnp.float32, -k, k)
        conv_b = jax.random.uniform(sub[3], (cout, 1), jnp.float32, -k, k)
        params.append(dict(
            wr_packed=pack(wr), wi_packed=pack(wi),
            conv_w=conv_w.astype(jnp.bfloat16),     # tiny; cast once at init
            conv_b=conv_b, modes=(m1, m2), cout=cout,
            use_tanh=(funcs[i] == "tanh")))
    return params


if __name__ == "__main__":
    # Small, module-consistent shapes:
    #   dimensions=2, input [batch, X, Y, channels], padding=8,
    #   inner_size=8, n_layers=2, n_modes=[4, 4], func=Tanh.
    B, X, Y = 2, 16, 16
    input_numb_fields, output_numb_fields = 4, 4
    inner_size, n_layers = 8, 2
    n_modes = (4, 4)
    padding = 8

    key = jax.random.PRNGKey(0)
    k_x, k_p = jax.random.split(key)
    x = jax.random.normal(k_x, (B, X, Y, input_numb_fields), dtype=jnp.float32)
    params = init_params(k_p, input_numb_fields, output_numb_fields,
                         n_modes, inner_size, n_layers)

    out = fourier_integral_kernel_forward(x, params, padding)
    out = jax.block_until_ready(out)

    assert out.shape == (B, X, Y, inner_size), out.shape
    assert out.dtype == jnp.float32
    assert bool(jnp.all(jnp.isfinite(out)))
    print("KERNEL_OK")
</pallas_src>

<mosaic_0001>
module attributes {stable_mosaic.version = 11 : i64} {
  func.func @_spectral_kernel(%arg0: i32, %arg1: i32, %arg2: memref<4x2x128xf32, #tpu.memory_space<vmem>>, %arg3: memref<4x2x128xf32, #tpu.memory_space<vmem>>, %arg4: memref<4x8x128xf32, #tpu.memory_space<vmem>>, %arg5: memref<4x8x128xf32, #tpu.memory_space<vmem>>, %arg6: memref<2x8x128xf32, #tpu.memory_space<vmem>>, %arg7: memref<2x8x128xf32, #tpu.memory_space<vmem>>) attributes {dimension_semantics = [#tpu.dimension_semantics<parallel>, #tpu.dimension_semantics<parallel>], iteration_bounds = array<i64: 1, 1>, scalar_prefetch = 0 : i64, scratch_operands = 0 : i64, tpu.core_type = #tpu.core_type<tc>, window_params = [{transform_indices = @transform_0, window_bounds = array<i64: 4, 2, 128>}, {transform_indices = @transform_1, window_bounds = array<i64: 4, 2, 128>}, {transform_indices = @transform_2, window_bounds = array<i64: 4, 8, 128>}, {transform_indices = @transform_3, window_bounds = array<i64: 4, 8, 128>}, {transform_indices = @transform_4, window_bounds = array<i64: 2, 8, 128>}, {transform_indices = @transform_5, window_bounds = array<i64: 2, 8, 128>}]} {
    %cst = arith.constant 0.000000e+00 : f32
    %0 = vector.broadcast %cst : f32 to vector<2x8x128xf32>
    %c0_i32 = arith.constant 0 : i32
    %1 = arith.index_cast %c0_i32 : i32 to index
    %c0 = arith.constant 0 : index
    %c0_0 = arith.constant 0 : index
    %2 = vector.load %arg2[%1, %c0, %c0_0] : memref<4x2x128xf32, #tpu.memory_space<vmem>>, vector<1x2x128xf32>
    %3 = vector.shape_cast %2 : vector<1x2x128xf32> to vector<2x128xf32>
    %4 = vector.shape_cast %3 : vector<2x128xf32> to vector<2x1x128xf32>
    %5 = arith.index_cast %c0_i32 : i32 to index
    %c0_1 = arith.constant 0 : index
    %c0_2 = arith.constant 0 : index
    %6 = vector.load %arg3[%5, %c0_1, %c0_2] : memref<4x2x128xf32, #tpu.memory_space<vmem>>, vector<1x2x128xf32>
    %7 = vector.shape_cast %6 : vector<1x2x128xf32> to vector<2x128xf32>
    %8 = vector.shape_cast %7 : vector<2x128xf32> to vector<2x1x128xf32>
    %9 = arith.index_cast %c0_i32 : i32 to index
    %c0_3 = arith.constant 0 : index
    %c0_4 = arith.constant 0 : index
    %10 = vector.load %arg4[%9, %c0_3, %c0_4] : memref<4x8x128xf32, #tpu.memory_space<vmem>>, vector<1x8x128xf32>
    %11 = vector.shape_cast %10 : vector<1x8x128xf32> to vector<8x128xf32>
    %12 = vector.shape_cast %11 : vector<8x128xf32> to vector<1x8x128xf32>
    %13 = arith.index_cast %c0_i32 : i32 to index
    %c0_5 = arith.constant 0 : index
    %c0_6 = arith.constant 0 : index
    %14 = vector.load %arg5[%13, %c0_5, %c0_6] : memref<4x8x128xf32, #tpu.memory_space<vmem>>, vector<1x8x128xf32>
    %15 = vector.shape_cast %14 : vector<1x8x128xf32> to vector<8x128xf32>
    %16 = vector.shape_cast %15 : vector<8x128xf32> to vector<1x8x128xf32>
    %17 = vector.broadcast %4 : vector<2x1x128xf32> to vector<2x8x128xf32>
    %18 = vector.broadcast %12 : vector<1x8x128xf32> to vector<2x8x128xf32>
    %19 = arith.mulf %17, %18 : vector<2x8x128xf32>
    %20 = arith.addf %0, %19 : vector<2x8x128xf32>
    %21 = vector.broadcast %8 : vector<2x1x128xf32> to vector<2x8x128xf32>
    %22 = vector.broadcast %16 : vector<1x8x128xf32> to vector<2x8x128xf32>
    %23 = arith.mulf %21, %22 : vector<2x8x128xf32>
    %24 = arith.subf %20, %23 : vector<2x8x128xf32>
    %25 = vector.broadcast %4 : vector<2x1x128xf32> to vector<2x8x128xf32>
    %26 = vector.broadcast %16 : vector<1x8x128xf32> to vector<2x8x128xf32>
    %27 = arith.mulf %25, %26 : vector<2x8x128xf32>
    %28 = arith.addf %0, %27 : vector<2x8x128xf32>
    %29 = vector.broadcast %8 : vector<2x1x128xf32> to vector<2x8x128xf32>
    %30 = vector.broadcast %12 : vector<1x8x128xf32> to vector<2x8x128xf32>
    %31 = arith.mulf %29, %30 : vector<2x8x128xf32>
    %32 = arith.addf %28, %31 : vector<2x8x128xf32>
    %c1_i32 = arith.constant 1 : i32
    %33 = arith.index_cast %c1_i32 : i32 to index
    %c0_7 = arith.constant 0 : index
    %c0_8 = arith.constant 0 : index
    %34 = vector.load %arg2[%33, %c0_7, %c0_8] : memref<4x2x128xf32, #tpu.memory_space<vmem>>, vector<1x2x128xf32>
    %35 = vector.shape_cast %34 : vector<1x2x128xf32> to vector<2x128xf32>
    %36 = vector.shape_cast %35 : vector<2x128xf32> to vector<2x1x128xf32>
    %37 = arith.index_cast %c1_i32 : i32 to index
    %c0_9 = arith.constant 0 : index
    %c0_10 = arith.constant 0 : index
    %38 = vector.load %arg3[%37, %c0_9, %c0_10] : memref<4x2x128xf32, #tpu.memory_space<vmem>>, vector<1x2x128xf32>
    %39 = vector.shape_cast %38 : vector<1x2x128xf32> to vector<2x128xf32>
    %40 = vector.shape_cast %39 : vector<2x128xf32> to vector<2x1x128xf32>
    %41 = arith.index_cast %c1_i32 : i32 to index
    %c0_11 = arith.constant 0 : index
    %c0_12 = arith.constant 0 : index
    %42 = vector.load %arg4[%41, %c0_11, %c0_12] : memref<4x8x128xf32, #tpu.memory_space<vmem>>, vector<1x8x128xf32>
    %43 = vector.shape_cast %42 : vector<1x8x128xf32> to vector<8x128xf32>
    %44 = vector.shape_cast %43 : vector<8x128xf32> to vector<1x8x128xf32>
    %45 = arith.index_cast %c1_i32 : i32 to index
    %c0_13 = arith.constant 0 : index
    %c0_14 = arith.constant 0 : index
    %46 = vector.load %arg5[%45, %c0_13, %c0_14] : memref<4x8x128xf32, #tpu.memory_space<vmem>>, vector<1x8x128xf32>
    %47 = vector.shape_cast %46 : vector<1x8x128xf32> to vector<8x128xf32>
    %48 = vector.shape_cast %47 : vector<8x128xf32> to vector<1x8x128xf32>
    %49 = vector.broadcast %36 : vector<2x1x128xf32> to vector<2x8x128xf32>
    %50 = vector.broadcast %44 : vector<1x8x128xf32> to vector<2x8x128xf32>
    %51 = arith.mulf %49, %50 : vector<2x8x128xf32>
    %52 = arith.addf %24, %51 : vector<2x8x128xf32>
    %53 = vector.broadcast %40 : vector<2x1x128xf32> to vector<2x8x128xf32>
    %54 = vector.broadcast %48 : vector<1x8x128xf32> to vector<2x8x128xf32>
    %55 = arith.mulf %53, %54 : vector<2x8x128xf32>
    %56 = arith.subf %52, %55 : vector<2x8x128xf32>
    %57 = vector.broadcast %36 : vector<2x1x128xf32> to vector<2x8x128xf32>
    %58 = vector.broadcast %48 : vector<1x8x128xf32> to vector<2x8x128xf32>
    %59 = arith.mulf %57, %58 : vector<2x8x128xf32>
    %60 = arith.addf %32, %59 : vector<2x8x128xf32>
    %61 = vector.broadcast %40 : vector<2x1x128xf32> to vector<2x8x128xf32>
    %62 = vector.broadcast %44 : vector<1x8x128xf32> to vector<2x8x128xf32>
    %63 = arith.mulf %61, %62 : vector<2x8x128xf32>
    %64 = arith.addf %60, %63 : vector<2x8x128xf32>
    %c2_i32 = arith.constant 2 : i32
    %65 = arith.index_cast %c2_i32 : i32 to index
    %c0_15 = arith.constant 0 : index
    %c0_16 = arith.constant 0 : index
    %66 = vector.load %arg2[%65, %c0_15, %c0_16] : memref<4x2x128xf32, #tpu.memory_space<vmem>>, vector<1x2x128xf32>
    %67 = vector.shape_cast %66 : vector<1x2x128xf32> to vector<2x128xf32>
    %68 = vector.shape_cast %67 : vector<2x128xf32> to vector<2x1x128xf32>
    %69 = arith.index_cast %c2_i32 : i32 to index
    %c0_17 = arith.constant 0 : index
    %c0_18 = arith.constant 0 : index
    %70 = vector.load %arg3[%69, %c0_17, %c0_18] : memref<4x2x128xf32, #tpu.memory_space<vmem>>, vector<1x2x128xf32>
    %71 = vector.shape_cast %70 : vector<1x2x128xf32> to vector<2x128xf32>
    %72 = vector.shape_cast %71 : vector<2x128xf32> to vector<2x1x128xf32>
    %73 = arith.index_cast %c2_i32 : i32 to index
    %c0_19 = arith.constant 0 : index
    %c0_20 = arith.constant 0 : index
    %74 = vector.load %arg4[%73, %c0_19, %c0_20] : memref<4x8x128xf32, #tpu.memory_space<vmem>>, vector<1x8x128xf32>
    %75 = vector.shape_cast %74 : vector<1x8x128xf32> to vector<8x128xf32>
    %76 = vector.shape_cast %75 : vector<8x128xf32> to vector<1x8x128xf32>
    %77 = arith.index_cast %c2_i32 : i32 to index
    %c0_21 = arith.constant 0 : index
    %c0_22 = arith.constant 0 : index
    %78 = vector.load %arg5[%77, %c0_21, %c0_22] : memref<4x8x128xf32, #tpu.memory_space<vmem>>, vector<1x8x128xf32>
    %79 = vector.shape_cast %78 : vector<1x8x128xf32> to vector<8x128xf32>
    %80 = vector.shape_cast %79 : vector<8x128xf32> to vector<1x8x128xf32>
    %81 = vector.broadcast %68 : vector<2x1x128xf32> to vector<2x8x128xf32>
    %82 = vector.broadcast %76 : vector<1x8x128xf32> to vector<2x8x128xf32>
    %83 = arith.mulf %81, %82 : vector<2x8x128xf32>
    %84 = arith.addf %56, %83 : vector<2x8x128xf32>
    %85 = vector.broadcast %72 : vector<2x1x128xf32> to vector<2x8x128xf32>
    %86 = vector.broadcast %80 : vector<1x8x128xf32> to vector<2x8x128xf32>
    %87 = arith.mulf %85, %86 : vector<2x8x128xf32>
    %88 = arith.subf %84, %87 : vector<2x8x128xf32>
    %89 = vector.broadcast %68 : vector<2x1x128xf32> to vector<2x8x128xf32>
    %90 = vector.broadcast %80 : vector<1x8x128xf32> to vector<2x8x128xf32>
    %91 = arith.mulf %89, %90 : vector<2x8x128xf32>
    %92 = arith.addf %64, %91 : vector<2x8x128xf32>
    %93 = vector.broadcast %72 : vector<2x1x128xf32> to vector<2x8x128xf32>
    %94 = vector.broadcast %76 : vector<1x8x128xf32> to vector<2x8x128xf32>
    %95 = arith.mulf %93, %94 : vector<2x8x128xf32>
    %96 = arith.addf %92, %95 : vector<2x8x128xf32>
    %c3_i32 = arith.constant 3 : i32
    %97 = arith.index_cast %c3_i32 : i32 to index
    %c0_23 = arith.constant 0 : index
    %c0_24 = arith.constant 0 : index
    %98 = vector.load %arg2[%97, %c0_23, %c0_24] : memref<4x2x128xf32, #tpu.memory_space<vmem>>, vector<1x2x128xf32>
    %99 = vector.shape_cast %98 : vector<1x2x128xf32> to vector<2x128xf32>
    %100 = vector.shape_cast %99 : vector<2x128xf32> to vector<2x1x128xf32>
    %101 = arith.index_cast %c3_i32 : i32 to index
    %c0_25 = arith.constant 0 : index
    %c0_26 = arith.constant 0 : index
    %102 = vector.load %arg3[%101, %c0_25, %c0_26] : memref<4x2x128xf32, #tpu.memory_space<vmem>>, vector<1x2x128xf32>
    %103 = vector.shape_cast %102 : vector<1x2x128xf32> to vector<2x128xf32>
    %104 = vector.shape_cast %103 : vector<2x128xf32> to vector<2x1x128xf32>
    %105 = arith.index_cast %c3_i32 : i32 to index
    %c0_27 = arith.constant 0 : index
    %c0_28 = arith.constant 0 : index
    %106 = vector.load %arg4[%105, %c0_27, %c0_28] : memref<4x8x128xf32, #tpu.memory_space<vmem>>, vector<1x8x128xf32>
    %107 = vector.shape_cast %106 : vector<1x8x128xf32> to vector<8x128xf32>
    %108 = vector.shape_cast %107 : vector<8x128xf32> to vector<1x8x128xf32>
    %109 = arith.index_cast %c3_i32 : i32 to index
    %c0_29 = arith.constant 0 : index
    %c0_30 = arith.constant 0 : index
    %110 = vector.load %arg5[%109, %c0_29, %c0_30] : memref<4x8x128xf32, #tpu.memory_space<vmem>>, vector<1x8x128xf32>
    %111 = vector.shape_cast %110 : vector<1x8x128xf32> to vector<8x128xf32>
    %112 = vector.shape_cast %111 : vector<8x128xf32> to vector<1x8x128xf32>
    %113 = vector.broadcast %100 : vector<2x1x128xf32> to vector<2x8x128xf32>
    %114 = vector.broadcast %108 : vector<1x8x128xf32> to vector<2x8x128xf32>
    %115 = arith.mulf %113, %114 : vector<2x8x128xf32>
    %116 = arith.addf %88, %115 : vector<2x8x128xf32>
    %117 = vector.broadcast %104 : vector<2x1x128xf32> to vector<2x8x128xf32>
    %118 = vector.broadcast %112 : vector<1x8x128xf32> to vector<2x8x128xf32>
    %119 = arith.mulf %117, %118 : vector<2x8x128xf32>
    %120 = arith.subf %116, %119 : vector<2x8x128xf32>
    %121 = vector.broadcast %100 : vector<2x1x128xf32> to vector<2x8x128xf32>
    %122 = vector.broadcast %112 : vector<1x8x128xf32> to vector<2x8x128xf32>
    %123 = arith.mulf %121, %122 : vector<2x8x128xf32>
    %124 = arith.addf %96, %123 : vector<2x8x128xf32>
    %125 = vector.broadcast %104 : vector<2x1x128xf32> to vector<2x8x128xf32>
    %126 = vector.broadcast %108 : vector<1x8x128xf32> to vector<2x8x128xf32>
    %127 = arith.mulf %125, %126 : vector<2x8x128xf32>
    %128 = arith.addf %124, %127 : vector<2x8x128xf32>
    %c4_i32 = arith.constant 4 : i32
    %c0_31 = arith.constant 0 : index
    %c0_32 = arith.constant 0 : index
    %c0_33 = arith.constant 0 : index
    %129 = vector.load %arg6[%c0_31, %c0_32, %c0_33] : memref<2x8x128xf32, #tpu.memory_space<vmem>>, vector<2x8x128xf32>
    tpu.vector_store %arg6[%c0_31, %c0_32, %c0_33], %120 {strides = array<i32>} : memref<2x8x128xf32, #tpu.memory_space<vmem>>, vector<2x8x128xf32>,
    %c0_34 = arith.constant 0 : index
    %c0_35 = arith.constant 0 : index
    %c0_36 = arith.constant 0 : index
    %130 = vector.load %arg7[%c0_34, %c0_35, %c0_36] : memref<2x8x128xf32, #tpu.memory_space<vmem>>, vector<2x8x128xf32>
    tpu.vector_store %arg7[%c0_34, %c0_35, %c0_36], %128 {strides = array<i32>} : memref<2x8x128xf32, #tpu.memory_space<vmem>>, vector<2x8x128xf32>,
    return
  }
  func.func @transform_0(%arg0: i32, %arg1: i32) -> (i32, i32, i32) {
    %c0_i32 = arith.constant 0 : i32
    %c0_i32_0 = arith.constant 0 : i32
    %c0_i32_1 = arith.constant 0 : i32
    return %c0_i32, %c0_i32_0, %arg1 : i32, i32, i32
  }
  func.func @transform_1(%arg0: i32, %arg1: i32) -> (i32, i32, i32) {
    %c0_i32 = arith.constant 0 : i32
    %c0_i32_0 = arith.constant 0 : i32
    %c0_i32_1 = arith.constant 0 : i32
    return %c0_i32, %c0_i32_0, %arg1 : i32, i32, i32
  }
  func.func @transform_2(%arg0: i32, %arg1: i32) -> (i32, i32, i32) {
    %c0_i32 = arith.constant 0 : i32
    %c0_i32_0 = arith.constant 0 : i32
    return %c0_i32, %arg0, %arg1 : i32, i32, i32
  }
  func.func @transform_3(%arg0: i32, %arg1: i32) -> (i32, i32, i32) {
    %c0_i32 = arith.constant 0 : i32
    %c0_i32_0 = arith.constant 0 : i32
    return %c0_i32, %arg0, %arg1 : i32, i32, i32
  }
  func.func @transform_4(%arg0: i32, %arg1: i32) -> (i32, i32, i32) {
    %c0_i32 = arith.constant 0 : i32
    %c0_i32_0 = arith.constant 0 : i32
    return %c0_i32, %arg0, %arg1 : i32, i32, i32
  }
  func.func @transform_5(%arg0: i32, %arg1: i32) -> (i32, i32, i32) {
    %c0_i32 = arith.constant 0 : i32
    %c0_i32_0 = arith.constant 0 : i32
    return %c0_i32, %arg0, %arg1 : i32, i32, i32
  }
}

</mosaic_0001>

<bundles_post_ra>
// kernel: tpu_custom_call.1
= control target key start
LH: loop header
LB: loop body
LE: loop exit
PB: predicated region body
PF: predicated region fallthrough
CT: control target
= control target key end

     0   :  { %11 = vsyncpa [#allocation3], 0  ;;  %s779_s0 = inlined_call_operand.hbm [shape: f32[4,2,128], index: 0, kind: input, shape index: {}]   ;;  %s780_s1 = inlined_call_operand.hbm [shape: f32[4,2,128], index: 1, kind: input, shape index: {}]   ;;  %s781_s2 = inlined_call_operand.hbm [shape: f32[4,8,128], index: 2, kind: input, shape index: {}]   ;;  %s782_s3 = inlined_call_operand.hbm [shape: f32[4,8,128], index: 3, kind: input, shape index: {}]   ;;  %s783_s4 = inlined_call_operand.hbm [shape: f32[2,8,128], index: 4, kind: output, shape index: {0}]   ;;  %s784_s5 = inlined_call_operand.hbm [shape: f32[2,8,128], index: 5, kind: output, shape index: {1}]  }
   0x1   :  { %12 = vsyncpa [#allocation6], 0 }
   0x2   :  { %13 = vsyncpa [#allocation9], 0 }
   0x3   :  { %14 = vsyncpa [#allocation4], 0 }
   0x4   :  { %15 = vsyncpa [#allocation12], 0  ;;  %s620_s18 = smov [#allocation5]   ;;  %s621_s20 = smov [#allocation2]  }
   0x5   :  { %s33_s19 = sshll.u32 %s620_s18, 4  ;;  %s21_s21 = sshll.u32 %s621_s20, 4  ;;  %s34_s19 = int_to_ptr.vmem [resolvable:$true] %s33_s19  ;;  %s22_s21 = int_to_ptr.vmem [resolvable:$true] %s21_s21 }
   0x6   :  { %s498_s22 = scalar_lea.vmem %s34_s19, 128  ;;  %p503_p1 = scmp.lt.s32.totalorder %s34_s19, %s34_s19 }
   0x7   :  { %p499_p0 = scmp.ne.s32.totalorder %s34_s19, %s498_s22  ;;  %p504_p2 = scmp.lt.s32.totalorder %s498_s22, %s498_s22 }
   0x9   :  { %p505_p3 = por %p504_p2, %p503_p1 }
   0xb   :  { %p506_p4 = pnand %p505_p3, %p499_p0 }
   0xd   :  { %509 = shalt.err (!%p506_p4)
}
   0xe   :  { %s622_s23 = smov 32   ;;  %s623_s24 = smov 2  }
   0xf   :  { %39 = dma.hbm_to_vmem [thread:$0]  %s780_s1, 128, %s34_s19, [#allocation6], %s622_s23, %s622_s23, %s623_s24  }
  0x10   :  { %s518_s27 = scalar_lea.vmem %s22_s21, 128  ;;  %p523_p6 = scmp.lt.s32.totalorder %s22_s21, %s22_s21 }
  0x11   :  { %p519_p5 = scmp.ne.s32.totalorder %s22_s21, %s518_s27  ;;  %p524_p7 = scmp.lt.s32.totalorder %s518_s27, %s518_s27 }
  0x13   :  { %p525_p8 = por %p524_p7, %p523_p6 }
  0x15   :  { %p526_p9 = pnand %p525_p8, %p519_p5 }
  0x17   :  { %529 = shalt.err (!%p526_p9)
}
  0x18   :  { %27 = dma.hbm_to_vmem [thread:$0]  %s779_s0, 128, %s22_s21, [#allocation3], %s622_s23, %s622_s23, %s623_s24  }
  0x19   :  { %s624_s30 = smov [#allocation7]  }
  0x1a   :  { %s45_s6 = sshll.u32 %s624_s30, 4  ;;  %s46_s6 = int_to_ptr.vmem [resolvable:$true] %s45_s6 }
  0x1b   :  { %s538_s7 = scalar_lea.vmem %s46_s6, 512  ;;  %p543_p11 = scmp.lt.s32.totalorder %s46_s6, %s46_s6 }
  0x1c   :  { %p539_p10 = scmp.ne.s32.totalorder %s46_s6, %s538_s7  ;;  %p544_p12 = scmp.lt.s32.totalorder %s538_s7, %s538_s7 }
  0x1e   :  { %p545_p13 = por %p544_p12, %p543_p11 }
  0x20   :  { %p546_p0 = pnand %p545_p13, %p539_p10 }
  0x22   :  { %549 = shalt.err (!%p546_p0)
}
  0x23   :  { %s625_s1 = smov 128   ;;  %s626_s8 = smov 8  }
  0x24   :  { %51 = dma.hbm_to_vmem [thread:$0]  %s781_s2, 512, %s46_s6, [#allocation6], %s625_s1, %s625_s1, %s626_s8  }
  0x25   :  { %s627_s0 = smov [#allocation8]  }
  0x26   :  { %s57_s11 = sshll.u32 %s627_s0, 4  ;;  %s58_s11 = int_to_ptr.vmem [resolvable:$true] %s57_s11 }
  0x27   :  { %s558_s12 = scalar_lea.vmem %s58_s11, 512  ;;  %p563_p2 = scmp.lt.s32.totalorder %s58_s11, %s58_s11 }
  0x28   :  { %p559_p1 = scmp.ne.s32.totalorder %s58_s11, %s558_s12  ;;  %p564_p3 = scmp.lt.s32.totalorder %s558_s12, %s558_s12 }
  0x2a   :  { %p565_p4 = por %p564_p3, %p563_p2 }
  0x2c   :  { %p566_p5 = pnand %p565_p4, %p559_p1 }
  0x2e   :  { %569 = shalt.err (!%p566_p5)
}
  0x2f   :  { %63 = dma.hbm_to_vmem [thread:$0]  %s782_s3, 512, %s58_s11, [#allocation9], %s625_s1, %s625_s1, %s626_s8  }
  0x30   :  { %610 = dma.done.wait [#allocation3], 128  }
  0x31   :  { %611 = vsyncadd [#allocation3], 4294967168 }
  0x32   :  { %612 = dma.done.wait [#allocation6], 640  }
  0x33   :  { %613 = vsyncadd [#allocation6], 4294966656 }
  0x34   :  { %614 = dma.done.wait [#allocation9], 512  }
  0x35   :  { %615 = vsyncadd [#allocation9], 4294966784  ;;  %v89_v0 = vlaneseq  ;;  %v628_v1 = vmov 1966171168   ;;  %v685_v12 = vld [vmem:[#allocation7] sm:$0xff]  ;;  %v694_v23 = vld [vmem:[#allocation7 + $0x8] sm:$0xff] }
  0x36   :  { %v87_v2 = vunpack.c.l.s4 %v628_v1  ;;  %v471_v7 = vld.sshfl [vmem:[#allocation2] sm:$0x11 pattern:$0x75316420]  ;;  %v687_v15 = vld [vmem:[#allocation8] sm:$0xff]  ;;  %v709_v38 = vld [vmem:[#allocation8 + $0x8] sm:$0xff] }
  0x37   :  { %v90_v3 = vshrl.u32 %v89_v0, 7  ;;  %v472_v9 = vld.sshfl [vmem:[#allocation5] sm:$0x11 pattern:$0x75316420]  ;;  %v85_v10 = vcombine.high %v471_v7, %v471_v7  ;;  %v706_v35 = vld [vmem:[#allocation7 + $0x10] sm:$0xff] }
  0x38   :  { %v88_v4 = vunpack.c.0.s8 %v87_v2  ;;  %v473_v13 = vld.sshfl [vmem:[#allocation2 + $0x2] sm:$0x11 pattern:$0x75316420]  ;;  %v109_v14 = vcombine.high %v472_v9, %v472_v9  ;;  %v719_v48 = vld [vmem:[#allocation7 + $0x18] sm:$0xff]  ;;  %s629_s2 = smov [#allocation10]  }
  0x39   :  { %v681_v6 = vsub.s32 0, %v90_v3  ;;  %v474_v18 = vld.sshfl [vmem:[#allocation5 + $0x2] sm:$0x11 pattern:$0x75316420]  ;;  %v172_v20 = vcombine.high %v473_v13, %v473_v13  ;;  %v721_v49 = vld [vmem:[#allocation8 + $0x10] sm:$0xff] }
  0x3a   :  { %v679_v5 = vsub.s32 %v88_v4, %v90_v3  ;;  %v475_v24 = vld.sshfl [vmem:[#allocation2 + $0x4] sm:$0x11 pattern:$0x75316420]  ;;  %v197_v26 = vcombine.high %v474_v18, %v474_v18  ;;  %v730_v58 = vld [vmem:[#allocation8 + $0x18] sm:$0xff]  ;;  %s441_s3 = sshll.u32 %s629_s2, 4  ;;  %s442_s3 = int_to_ptr.vmem [resolvable:$true] %s441_s3 }
  0x3b   :  { %v476_v30 = vld.sshfl [vmem:[#allocation5 + $0x4] sm:$0x11 pattern:$0x75316420]  ;;  %v262_v62 = vcombine.high %v475_v24, %v475_v24  ;;  %s570_s15 = scalar_lea.vmem %s442_s3, 256  ;;  %p575_p7 = scmp.lt.s32.totalorder %s442_s3, %s442_s3 }
  0x3c   :  { %v92_v8 = vrot.slane %v471_v7, %v679_v5  ;;  %v116_v11 = vrot.slane %v472_v9, %v679_v5  ;;  %v179_v17 = vrot.slane %v473_v13, %v679_v5  ;;  %v99_v19 = vrot.slane %v85_v10, %v679_v5  ;;  %v477_v36 = vld.sshfl [vmem:[#allocation2 + $0x6] sm:$0x11 pattern:$0x75316420]  ;;  %p571_p6 = scmp.ne.s32.totalorder %s442_s3, %s570_s15  ;;  %p576_p8 = scmp.lt.s32.totalorder %s570_s15, %s570_s15 }
  0x3d   :  { %v204_v22 = vrot.slane %v474_v18, %v679_v5  ;;  %v123_v25 = vrot.slane %v109_v14, %v679_v5  ;;  %v269_v29 = vrot.slane %v475_v24, %v679_v5  ;;  %v294_v34 = vrot.slane %v476_v30, %v679_v5  ;;  %v478_v42 = vld.sshfl [vmem:[#allocation5 + $0x6] sm:$0x11 pattern:$0x75316420] }
  0x3e   :  { %v129_v16 = vrot.slane %v92_v8, %v681_v6  ;;  %v143_v21 = vrot.slane %v116_v11, %v681_v6  ;;  %v219_v28 = vrot.slane %v179_v17, %v681_v6  ;;  %v701_v31 = vrot.slane %v99_v19, %v681_v6  ;;  %p577_p9 = por %p576_p8, %p575_p7 }
  0x3f   :  { %v233_v33 = vrot.slane %v204_v22, %v681_v6  ;;  %v147_v37 = vrot.slane %v123_v25, %v681_v6  ;;  %v309_v40 = vrot.slane %v269_v29, %v681_v6  ;;  %v359_v41 = vrot.slane %v477_v36, %v679_v5 }
  0x40   :  { %v136_v27 = vmul.f32 %v129_v16, %v685_v12  ;;  %v150_v32 = vmul.f32 %v143_v21, %v687_v15  ;;  %v226_v39 = vmul.f32 %v219_v28, %v694_v23  ;;  %v137_v43 = vmul.f32 %v701_v31, %v685_v12  ;;  %p578_p10 = pnand %p577_p9, %p571_p6 }
  0x41   :  { %v240_v45 = vmul.f32 %v233_v33, %v709_v38  ;;  %v323_v46 = vrot.slane %v294_v34, %v681_v6  ;;  %v384_v47 = vrot.slane %v478_v42, %v679_v5  ;;  %v316_v50 = vmul.f32 %v309_v40, %v706_v35 }
  0x42   :  { %v152_v44 = vsub.f32 %v136_v27, %v150_v32  ;;  %v399_v51 = vrot.slane %v359_v41, %v681_v6  ;;  %v151_v52 = vmul.f32 %v147_v37, %v687_v15  ;;  %v186_v53 = vrot.slane %v172_v20, %v679_v5 }
  0x43   :  { %v330_v55 = vmul.f32 %v323_v46, %v721_v49  ;;  %v413_v56 = vrot.slane %v384_v47, %v681_v6  ;;  %v211_v57 = vrot.slane %v197_v26, %v679_v5  ;;  %v287_v2 = vcombine.high %v476_v30, %v476_v30 }
  0x44   :  { %v228_v54 = vadd.f32 %v226_v39, %v152_v44  ;;  %v406_v59 = vmul.f32 %v399_v51, %v719_v48  ;;  %v153_v60 = vsub.f32 %v137_v43, %v151_v52  ;;  %v223_v61 = vrot.slane %v186_v53, %v681_v6 }
  0x45   :  { %v420_v0 = vmul.f32 %v413_v56, %v730_v58  ;;  %v237_v1 = vrot.slane %v211_v57, %v681_v6  ;;  %v276_v4 = vrot.slane %v262_v62, %v679_v5  ;;  %v352_v7 = vcombine.high %v477_v36, %v477_v36 }
  0x46   :  { %v242_v63 = vsub.f32 %v228_v54, %v240_v45  ;;  %v227_v3 = vmul.f32 %v223_v61, %v694_v23  ;;  %v377_v8 = vcombine.high %v478_v42, %v478_v42  ;;  %v301_v11 = vrot.slane %v287_v2, %v679_v5 }
  0x47   :  { %v241_v10 = vmul.f32 %v237_v1, %v709_v38  ;;  %v154_v13 = vmul.f32 %v129_v16, %v687_v15  ;;  %v313_v17 = vrot.slane %v276_v4, %v681_v6  ;;  %v366_v18 = vrot.slane %v352_v7, %v679_v5 }
  0x48   :  { %v318_v9 = vadd.f32 %v316_v50, %v242_v63  ;;  %v229_v14 = vadd.f32 %v227_v3, %v153_v60  ;;  %v391_v19 = vrot.slane %v377_v8, %v679_v5  ;;  %v327_v22 = vrot.slane %v301_v11, %v681_v6 }
  0x49   :  { %v158_v24 = vmul.f32 %v143_v21, %v685_v12  ;;  %v244_v25 = vmul.f32 %v219_v28, %v709_v38  ;;  %v317_v27 = vmul.f32 %v313_v17, %v706_v35  ;;  %v403_v29 = vrot.slane %v366_v18, %v681_v6 }
  0x4a   :  { %v332_v20 = vsub.f32 %v318_v9, %v330_v55  ;;  %v243_v26 = vsub.f32 %v229_v14, %v241_v10  ;;  %v417_v16 = vrot.slane %v391_v19, %v681_v6  ;;  %v331_v32 = vmul.f32 %v327_v22, %v721_v49 }
  0x4b   :  { %v160_v34 = vadd.f32 %v158_v24, %v154_v13  ;;  %v248_v5 = vmul.f32 %v233_v33, %v694_v23  ;;  %v407_v39 = vmul.f32 %v403_v29, %v719_v48  ;;  %v334_v28 = vmul.f32 %v309_v40, %v721_v49 }
  0x4c   :  { %v408_v30 = vadd.f32 %v406_v59, %v332_v20  ;;  %v319_v36 = vadd.f32 %v317_v27, %v243_v26  ;;  %v421_v43 = vmul.f32 %v417_v16, %v730_v58  ;;  %v155_v44 = vmul.f32 %v701_v31, %v687_v15 }
  0x4d   :  { %v246_v21 = vadd.f32 %v244_v25, %v160_v34  ;;  %v159_v6 = vmul.f32 %v147_v37, %v685_v12  ;;  %v338_v47 = vmul.f32 %v323_v46, %v706_v35  ;;  %v245_v33 = vmul.f32 %v223_v61, %v709_v38 }
  0x4e   :  { %v422_v41 = vsub.f32 %v408_v30, %v420_v0  ;;  %v333_v42 = vsub.f32 %v319_v36, %v331_v32  ;;  %v249_v40 = vmul.f32 %v237_v1, %v694_v23  ;;  %v424_v54 = vmul.f32 %v399_v51, %v730_v58 }
  0x4f   :  { %v250_v45 = vadd.f32 %v248_v5, %v246_v21  ;;  %v161_v52 = vadd.f32 %v159_v6, %v155_v44  ;;  %v335_v15 = vmul.f32 %v313_v17, %v721_v49  ;;  %v428_v31 = vmul.f32 %v413_v56, %v719_v48 }
  0x50   :  { %432 = vst [vmem:[#allocation10] sm:$0xff] %v422_v41  ;;  %v409_v50 = vadd.f32 %v407_v39, %v333_v42  ;;  %v339_v38 = vmul.f32 %v327_v22, %v706_v35 }
  0x51   :  { %v336_v53 = vadd.f32 %v334_v28, %v250_v45  ;;  %v247_v57 = vadd.f32 %v245_v33, %v161_v52 }
  0x52   :  { %v423_v55 = vsub.f32 %v409_v50, %v421_v43 }
  0x53   :  { %v340_v12 = vadd.f32 %v338_v47, %v336_v53  ;;  %v251_v37 = vadd.f32 %v249_v40, %v247_v57 }
  0x54   :  { %433 = vst [vmem:[#allocation10 + $0x8] sm:$0xff] %v423_v55 }
  0x55   :  { %v426_v46 = vadd.f32 %v424_v54, %v340_v12 }
  0x56   :  { %581 = shalt.err (!%p578_p10)
}
  0x57   :  { %447 = dma.vmem_to_hbm [thread:$0]  %s442_s3, 256, %s783_s4, [#allocation4], %s625_s1, %s625_s1, %s626_s8   ;;  %v337_v23 = vadd.f32 %v335_v15, %v251_v37  ;;  %v425_v49 = vmul.f32 %v403_v29, %v730_v58  ;;  %v430_v51 = vadd.f32 %v428_v31, %v426_v46  ;;  %v429_v56 = vmul.f32 %v417_v16, %v719_v48 }
  0x58   :  { %s630_s18 = smov [#allocation11]  }
  0x59   :  { %v341_v35 = vadd.f32 %v339_v38, %v337_v23  ;;  %434 = vst [vmem:[#allocation11] sm:$0xff] %v430_v51  ;;  %s453_s19 = sshll.u32 %s630_s18, 4  ;;  %s454_s19 = int_to_ptr.vmem [resolvable:$true] %s453_s19 }
  0x5a   :  { %s590_s20 = scalar_lea.vmem %s454_s19, 256  ;;  %p595_p12 = scmp.lt.s32.totalorder %s454_s19, %s454_s19 }
  0x5b   :  { %v427_v59 = vadd.f32 %v425_v49, %v341_v35  ;;  %p591_p11 = scmp.ne.s32.totalorder %s454_s19, %s590_s20  ;;  %p596_p13 = scmp.lt.s32.totalorder %s590_s20, %s590_s20 }
  0x5d   :  { %v431_v60 = vadd.f32 %v429_v56, %v427_v59  ;;  %p597_p0 = por %p596_p13, %p595_p12 }
  0x5f   :  { %435 = vst [vmem:[#allocation11 + $0x8] sm:$0xff] %v431_v60  ;;  %p598_p1 = pnand %p597_p0, %p591_p11 }
  0x61   :  { %601 = shalt.err (!%p598_p1)
}
  0x62   :  { %459 = dma.vmem_to_hbm [thread:$0]  %s454_s19, 256, %s784_s5, [#allocation12], %s625_s1, %s625_s1, %s626_s8  }
  0x63   :  { %616 = dma.done.wait [#allocation4], 256  }
  0x64   :  { %617 = vsyncadd [#allocation4], 4294967040 }
  0x65   :  { %618 = dma.done.wait [#allocation12], 256  }
  0x66   :  { %619 = vsyncadd [#allocation12], 4294967040 }
  0x67   :  { %466 = vsyncpa [#allocation3], 1 }
  0x68   :  { %467 = vsyncpa [#allocation6], 1 }
  0x69   :  { %468 = vsyncpa [#allocation9], 1 }
  0x6a   :  { %469 = vsyncpa [#allocation4], 1 }
  0x6b   :  { %470 = vsyncpa [#allocation12], 1 }

</bundles_post_ra>
